<compile_context>
chip_gen: v7x
topology: tpu7x:2x2x1
jax: 0.10.0
libtpu: 0.0.40
codegen_flags: <defaults>
</compile_context>

<pallas_src>
import jax
import jax.numpy as jnp
from jax.experimental import pallas as pl
from jax.experimental.pallas import tpu as pltpu

STATE_DIM = 16
H1 = 400
H2 = 300
H1_PAD = 512        # 400 -> next multiple of 128
H2_PAD = 384        # 300 -> next multiple of 128
HEAD_DIM = 4        # fused head columns: [dir_x, dir_y, tau, mag]
ACTION_DIM = 3      # output columns: [force_x, force_y, torque]
EPS = 1e-12         # torch.nn.functional.normalize default eps


def actor_kernel(s_ref, w1_ref, b1_ref, w2_ref, b2_ref, wh_ref, bh_ref, o_ref):
    # ---- hidden layers: bf16 operands into the MXU, f32 accumulate ----
    x = jnp.dot(s_ref[...].astype(jnp.bfloat16), w1_ref[...],
                preferred_element_type=jnp.float32)
    x = jnp.maximum(x + b1_ref[...], 0.0)

    x = jnp.dot(x.astype(jnp.bfloat16), w2_ref[...],
                preferred_element_type=jnp.float32)
    x = jnp.maximum(x + b2_ref[...], 0.0)

    # ---- fused heads: columns [dir_x, dir_y, tau, mag] ----
    h = jnp.dot(x.astype(jnp.bfloat16), wh_ref[...],
                preferred_element_type=jnp.float32) + bh_ref[...]

    # Whole-tile tanh (EUP); pick columns with a lane mask instead of concat.
    t = jnp.tanh(h)
    lane = jax.lax.broadcasted_iota(jnp.int32, h.shape, 1)

    # F.normalize(dim=1): v / max(||v||, eps) == v * rsqrt(max(||v||^2, eps^2))
    dir2 = jnp.where(lane < 2, t, 0.0)
    norm_sq = jnp.sum(dir2 * dir2, axis=1, keepdims=True)
    inv_norm = jax.lax.rsqrt(jnp.maximum(norm_sq, EPS * EPS))

    magnitude = jax.nn.sigmoid(h[:, 3:4])
    scale = magnitude * inv_norm                      # (tile_b, 1)

    # lanes 0,1 -> force = dir * |F|; lane 2 -> tau.  Store exactly the action
    # columns so the wrapper needs no extra slice kernel.
    res = jnp.where(lane < 2, t * scale, t)
    o_ref[...] = res[:, :ACTION_DIM]


def _tpu_generation_params():
    """Return (batch_tile_cap, vmem_limit_bytes, min_batch_splits)."""
    kind = ""
    try:
        kind = jax.devices()[0].device_kind.lower().replace(" ", "")
    except Exception:  # defensive; default backend is TPU
        pass
    if "v5lite" in kind or "v5e" in kind:
        # v5e: 1 TC, 128 MiB physical VMEM, 16 MiB scoped default -> raise the
        # limit, keep the tile moderate (~6-10 KiB of live activations / row).
        return 1024, 64 << 20, 1
    if "v6" in kind:
        # v6e: 1 TC, 128 MiB VMEM -> largest tile; megacore split buys nothing.
        return 4096, 96 << 20, 1
    if "v7" in kind:
        # v7x: 2 TCs, only 64 MiB VMEM *per TC* -> smaller cap, and always
        # split the batch into >= 2 balanced tiles so both cores do work.
        return 2048, 48 << 20, 2
    # v4 / v5p / unknown: assume dual-TensorCore, conservative VMEM budget.
    return 1024, 48 << 20, 2


def _round_up(x, m):
    return ((x + m - 1) // m) * m


def _choose_tile_b(batch, cap, min_splits):
    # Tiny batches: a single tile — per-call fixed cost dominates anyway and
    # splitting a few rows across TensorCores is pure overhead.
    if batch <= cap and (min_splits <= 1 or batch <= 256):
        return batch
    n_tiles = max(min_splits, pl.cdiv(batch, cap))
    return min(cap, _round_up(pl.cdiv(batch, n_tiles), 8))


def actor_forward(state, params, *, tile_b=None):
    """TD3 Actor forward.  Returns (B, 3) = [force_x, force_y, torque].

    NOTE: if this is invoked once per environment step with tiny B, batch
    states across envs/timesteps at the call site — at B <= 64 the per-call
    dispatch + ~0.4 MiB weight DMA dwarfs the nanoseconds of MXU work.
    """
    w1, b1, w2, b2, wh, bh = params
    B = state.shape[0]

    cap, vmem_limit, min_splits = _tpu_generation_params()
    if tile_b is None:
        tile_b = _choose_tile_b(B, cap, min_splits)
    else:
        tile_b = min(tile_b, B)            # caller override (8-aligned or == B)
    grid = (pl.cdiv(B, tile_b),)

    # Weights/biases: full block, constant index -> fetched once, VMEM-resident
    # across all grid steps; single-buffered (no point double-buffering a block
    # that never changes — the reclaimed VMEM goes toward a bigger batch tile).
    resident = lambda a: pl.BlockSpec(a.shape, lambda i: (0, 0),
                                      pipeline_mode=pl.Buffered(buffer_count=1))

    flops = 2 * B * (STATE_DIM * H1_PAD + H1_PAD * H2_PAD + H2_PAD * HEAD_DIM)
    bytes_accessed = (int(state.size) * state.dtype.itemsize
                      + B * ACTION_DIM * 4
                      + sum(int(p.size) * p.dtype.itemsize for p in params))
    cost = pl.CostEstimate(flops=flops, transcendentals=6 * B,
                           bytes_accessed=bytes_accessed)

    return pl.pallas_call(
        actor_kernel,
        out_shape=jax.ShapeDtypeStruct((B, ACTION_DIM), jnp.float32),
        grid=grid,
        in_specs=[
            pl.BlockSpec((tile_b, STATE_DIM), lambda i: (i, 0)),
            resident(w1), resident(b1),
            resident(w2), resident(b2),
            resident(wh), resident(bh),
        ],
        out_specs=pl.BlockSpec((tile_b, ACTION_DIM), lambda i: (i, 0)),
        compiler_params=pltpu.CompilerParams(
            dimension_semantics=("parallel",),   # shards batch tiles over TCs
            vmem_limit_bytes=vmem_limit,         # big tiles need scoped headroom
        ),
        cost_estimate=cost,
    )(state, w1, b1, w2, b2, wh, bh)


def init_params(key):
    """nn.Linear-style U(-1/sqrt(fan_in), 1/sqrt(fan_in)) init, then fuse heads,
    zero-pad hidden dims to 128 multiples and cast matmul weights to bf16."""
    def linear(key, fan_in, fan_out):
        kw, kb = jax.random.split(key)
        bound = 1.0 / jnp.sqrt(fan_in)
        w = jax.random.uniform(kw, (fan_in, fan_out), jnp.float32, -bound, bound)
        b = jax.random.uniform(kb, (1, fan_out), jnp.float32, -bound, bound)
        return w, b

    k1, k2, kd, km, kt = jax.random.split(key, 5)
    w1, b1 = linear(k1, STATE_DIM, H1)
    w2, b2 = linear(k2, H1, H2)
    wd, bd = linear(kd, H2, 2)   # dir_head
    wm, bm = linear(km, H2, 1)   # mag_head
    wt, bt = linear(kt, H2, 1)   # tau_head

    # Fused head, lane-friendly column order [dir_x, dir_y, tau, mag].
    wh = jnp.concatenate([wd, wt, wm], axis=1)           # (H2, 4)
    bh = jnp.concatenate([bd, bt, bm], axis=1)           # (1, 4)

    # Zero-pad hidden dims (padded units: zero weight + zero bias -> relu(0)=0
    # -> contribute nothing downstream, semantics preserved exactly).
    w1p = jnp.zeros((STATE_DIM, H1_PAD), jnp.float32).at[:, :H1].set(w1)
    b1p = jnp.zeros((1, H1_PAD), jnp.float32).at[:, :H1].set(b1)
    w2p = jnp.zeros((H1_PAD, H2_PAD), jnp.float32).at[:H1, :H2].set(w2)
    b2p = jnp.zeros((1, H2_PAD), jnp.float32).at[:, :H2].set(b2)
    whp = jnp.zeros((H2_PAD, HEAD_DIM), jnp.float32).at[:H2, :].set(wh)

    # bf16 matmul operands (MXU-native on v5e/v6e/v7x); biases stay f32.
    return (w1p.astype(jnp.bfloat16), b1p,
            w2p.astype(jnp.bfloat16), b2p,
            whp.astype(jnp.bfloat16), bh)


def actor_reference(state, params):
    """Pure-JAX reference with the same bf16 matmul operands / f32 accumulate."""
    w1, b1, w2, b2, wh, bh = params
    bf16 = jnp.bfloat16
    x = jnp.maximum(jnp.dot(state.astype(bf16), w1,
                            preferred_element_type=jnp.float32) + b1, 0.0)
    x = jnp.maximum(jnp.dot(x.astype(bf16), w2,
                            preferred_element_type=jnp.float32) + b2, 0.0)
    h = jnp.dot(x.astype(bf16), wh, preferred_element_type=jnp.float32) + bh
    d = jnp.tanh(h[:, 0:2])
    d = d / jnp.maximum(jnp.linalg.norm(d, axis=1, keepdims=True), EPS)
    mag = jax.nn.sigmoid(h[:, 3:4])
    tau = jnp.tanh(h[:, 2:3])
    return jnp.concatenate([d * mag, tau], axis=1)


if __name__ == "__main__":
    key = jax.random.PRNGKey(0)
    kp, ks1, ks2 = jax.random.split(key, 3)

    params = init_params(kp)

    # Smoke test: tiny batch, single tile.
    B = 8
    state = jax.random.normal(ks1, (B, STATE_DIM), jnp.float32)
    out = jax.block_until_ready(actor_forward(state, params))
    ref = actor_reference(state, params)
    assert out.shape == (B, ACTION_DIM)
    assert jnp.allclose(out, ref, atol=2e-3, rtol=2e-3), (out, ref)

    # Multi-tile + ragged-last-tile path (explicit small tile override).
    B2 = 200
    state2 = jax.random.normal(ks2, (B2, STATE_DIM), jnp.float32)
    out2 = jax.block_until_ready(actor_forward(state2, params, tile_b=64))
    ref2 = actor_reference(state2, params)
    assert out2.shape == (B2, ACTION_DIM)
    assert jnp.allclose(out2, ref2, atol=2e-3, rtol=2e-3)

    print("KERNEL_OK")
</pallas_src>

<mosaic_0001>
module attributes {stable_mosaic.version = 11 : i64} {
  func.func @actor_kernel(%arg0: i32, %arg1: memref<8x16xf32, #tpu.memory_space<vmem>>, %arg2: memref<16x512xbf16, #tpu.memory_space<vmem>>, %arg3: memref<1x512xf32, #tpu.memory_space<vmem>>, %arg4: memref<512x384xbf16, #tpu.memory_space<vmem>>, %arg5: memref<1x384xf32, #tpu.memory_space<vmem>>, %arg6: memref<384x4xbf16, #tpu.memory_space<vmem>>, %arg7: memref<1x4xf32, #tpu.memory_space<vmem>>, %arg8: memref<8x3xf32, #tpu.memory_space<vmem>>) attributes {dimension_semantics = [#tpu.dimension_semantics<parallel>], iteration_bounds = array<i64: 1>, scalar_prefetch = 0 : i64, scratch_operands = 0 : i64, tpu.core_type = #tpu.core_type<tc>, window_params = [{transform_indices = @transform_0, window_bounds = array<i64: 8, 16>}, {pipeline_mode = #tpu.pipeline_mode<synchronous>, transform_indices = @transform_1, window_bounds = array<i64: 16, 512>}, {pipeline_mode = #tpu.pipeline_mode<synchronous>, transform_indices = @transform_2, window_bounds = array<i64: 1, 512>}, {pipeline_mode = #tpu.pipeline_mode<synchronous>, transform_indices = @transform_3, window_bounds = array<i64: 512, 384>}, {pipeline_mode = #tpu.pipeline_mode<synchronous>, transform_indices = @transform_4, window_bounds = array<i64: 1, 384>}, {pipeline_mode = #tpu.pipeline_mode<synchronous>, transform_indices = @transform_5, window_bounds = array<i64: 384, 4>}, {pipeline_mode = #tpu.pipeline_mode<synchronous>, transform_indices = @transform_6, window_bounds = array<i64: 1, 4>}, {transform_indices = @transform_7, window_bounds = array<i64: 8, 3>}]} {
    %c0 = arith.constant 0 : index
    %c0_0 = arith.constant 0 : index
    %0 = vector.load %arg1[%c0, %c0_0] : memref<8x16xf32, #tpu.memory_space<vmem>>, vector<8x16xf32>
    %1 = arith.truncf %0 : vector<8x16xf32> to vector<8x16xbf16>
    %c0_1 = arith.constant 0 : index
    %c0_2 = arith.constant 0 : index
    %2 = vector.load %arg2[%c0_1, %c0_2] : memref<16x512xbf16, #tpu.memory_space<vmem>>, vector<16x512xbf16>
    %cst = arith.constant dense<0.000000e+00> : vector<8x512xf32>
    %3 = tpu.matmul %1, %2, %cst {dimension_numbers = #tpu.dot_dimension_numbers<[1], [0], [0], [1], [0, 0, 1, 1], [], []>} : vector<8x16xbf16>, vector<16x512xbf16>, vector<8x512xf32> -> vector<8x512xf32>
    %c0_3 = arith.constant 0 : index
    %c0_4 = arith.constant 0 : index
    %4 = vector.load %arg3[%c0_3, %c0_4] : memref<1x512xf32, #tpu.memory_space<vmem>>, vector<1x512xf32>
    %5 = vector.broadcast %4 : vector<1x512xf32> to vector<8x512xf32>
    %6 = arith.addf %3, %5 : vector<8x512xf32>
    %cst_5 = arith.constant 0.000000e+00 : f32
    %7 = vector.broadcast %cst_5 : f32 to vector<8x512xf32>
    %8 = arith.maximumf %6, %7 : vector<8x512xf32>
    %9 = arith.truncf %8 : vector<8x512xf32> to vector<8x512xbf16>
    %c0_6 = arith.constant 0 : index
    %c0_7 = arith.constant 0 : index
    %10 = vector.load %arg4[%c0_6, %c0_7] : memref<512x384xbf16, #tpu.memory_space<vmem>>, vector<512x384xbf16>
    %cst_8 = arith.constant dense<0.000000e+00> : vector<8x384xf32>
    %11 = tpu.matmul %9, %10, %cst_8 {dimension_numbers = #tpu.dot_dimension_numbers<[1], [0], [0], [1], [0, 0, 1, 1], [], []>} : vector<8x512xbf16>, vector<512x384xbf16>, vector<8x384xf32> -> vector<8x384xf32>
    %c0_9 = arith.constant 0 : index
    %c0_10 = arith.constant 0 : index
    %12 = vector.load %arg5[%c0_9, %c0_10] : memref<1x384xf32, #tpu.memory_space<vmem>>, vector<1x384xf32>
    %13 = vector.broadcast %12 : vector<1x384xf32> to vector<8x384xf32>
    %14 = arith.addf %11, %13 : vector<8x384xf32>
    %cst_11 = arith.constant 0.000000e+00 : f32
    %15 = vector.broadcast %cst_11 : f32 to vector<8x384xf32>
    %16 = arith.maximumf %14, %15 : vector<8x384xf32>
    %17 = arith.truncf %16 : vector<8x384xf32> to vector<8x384xbf16>
    %c0_12 = arith.constant 0 : index
    %c0_13 = arith.constant 0 : index
    %18 = vector.load %arg6[%c0_12, %c0_13] : memref<384x4xbf16, #tpu.memory_space<vmem>>, vector<384x4xbf16>
    %cst_14 = arith.constant dense<0.000000e+00> : vector<8x4xf32>
    %19 = tpu.matmul %17, %18, %cst_14 {dimension_numbers = #tpu.dot_dimension_numbers<[1], [0], [0], [1], [0, 0, 1, 1], [], []>} : vector<8x384xbf16>, vector<384x4xbf16>, vector<8x4xf32> -> vector<8x4xf32>
    %c0_15 = arith.constant 0 : index
    %c0_16 = arith.constant 0 : index
    %20 = vector.load %arg7[%c0_15, %c0_16] : memref<1x4xf32, #tpu.memory_space<vmem>>, vector<1x4xf32>
    %21 = vector.broadcast %20 : vector<1x4xf32> to vector<8x4xf32>
    %22 = arith.addf %19, %21 : vector<8x4xf32>
    %23 = math.tanh %22 : vector<8x4xf32>
    %24 = tpu.iota {dimensions = array<i32: 1>} : vector<8x4xi32>
    %c2_i32 = arith.constant 2 : i32
    %25 = vector.broadcast %c2_i32 : i32 to vector<8x4xi32>
    %26 = arith.cmpi slt, %24, %25 : vector<8x4xi32>
    %cst_17 = arith.constant 0.000000e+00 : f32
    %27 = vector.broadcast %cst_17 : f32 to vector<8x4xf32>
    %28 = arith.select %26, %23, %27 : vector<8x4xi1>, vector<8x4xf32>
    %29 = arith.mulf %28, %28 : vector<8x4xf32>
    %cst_18 = arith.constant dense<0.000000e+00> : vector<8xf32>
    %30 = vector.multi_reduction <add>, %29, %cst_18 [1] : vector<8x4xf32> to vector<8xf32>
    %31 = vector.shape_cast %30 : vector<8xf32> to vector<8x1xf32>
    %cst_19 = arith.constant 1.000000e-24 : f32
    %32 = vector.broadcast %cst_19 : f32 to vector<8x1xf32>
    %33 = arith.maximumf %31, %32 : vector<8x1xf32>
    %34 = math.rsqrt %33 : vector<8x1xf32>
    %35 = vector.extract_strided_slice %22 {offsets = [0, 3], sizes = [8, 1], strides = [1, 1]} : vector<8x4xf32> to vector<8x1xf32>
    %36 = arith.negf %35 : vector<8x1xf32>
    %37 = math.exp %36 : vector<8x1xf32>
    %cst_20 = arith.constant 1.000000e+00 : f32
    %38 = vector.broadcast %cst_20 : f32 to vector<8x1xf32>
    %39 = arith.addf %38, %37 : vector<8x1xf32>
    %40 = arith.divf %38, %39 : vector<8x1xf32>
    %41 = arith.mulf %40, %34 : vector<8x1xf32>
    %c2_i32_21 = arith.constant 2 : i32
    %42 = vector.broadcast %c2_i32_21 : i32 to vector<8x4xi32>
    %43 = arith.cmpi slt, %24, %42 : vector<8x4xi32>
    %44 = vector.broadcast %41 : vector<8x1xf32> to vector<8x4xf32>
    %45 = arith.mulf %23, %44 : vector<8x4xf32>
    %46 = arith.select %43, %45, %23 : vector<8x4xi1>, vector<8x4xf32>
    %47 = vector.extract_strided_slice %46 {offsets = [0, 0], sizes = [8, 3], strides = [1, 1]} : vector<8x4xf32> to vector<8x3xf32>
    %c0_22 = arith.constant 0 : index
    %c0_23 = arith.constant 0 : index
    %48 = vector.load %arg8[%c0_22, %c0_23] : memref<8x3xf32, #tpu.memory_space<vmem>>, vector<8x3xf32>
    tpu.vector_store %arg8[%c0_22, %c0_23], %47 {strides = array<i32>} : memref<8x3xf32, #tpu.memory_space<vmem>>, vector<8x3xf32>,
    return
  }
  func.func @transform_0(%arg0: i32) -> (i32, i32) {
    %c0_i32 = arith.constant 0 : i32
    %c0_i32_0 = arith.constant 0 : i32
    return %arg0, %c0_i32 : i32, i32
  }
  func.func @transform_1(%arg0: i32) -> (i32, i32) {
    %c0_i32 = arith.constant 0 : i32
    %c0_i32_0 = arith.constant 0 : i32
    %c0_i32_1 = arith.constant 0 : i32
    return %c0_i32, %c0_i32_0 : i32, i32
  }
  func.func @transform_2(%arg0: i32) -> (i32, i32) {
    %c0_i32 = arith.constant 0 : i32
    %c0_i32_0 = arith.constant 0 : i32
    %c0_i32_1 = arith.constant 0 : i32
    return %c0_i32, %c0_i32_0 : i32, i32
  }
  func.func @transform_3(%arg0: i32) -> (i32, i32) {
    %c0_i32 = arith.constant 0 : i32
    %c0_i32_0 = arith.constant 0 : i32
    %c0_i32_1 = arith.constant 0 : i32
    return %c0_i32, %c0_i32_0 : i32, i32
  }
  func.func @transform_4(%arg0: i32) -> (i32, i32) {
    %c0_i32 = arith.constant 0 : i32
    %c0_i32_0 = arith.constant 0 : i32
    %c0_i32_1 = arith.constant 0 : i32
    return %c0_i32, %c0_i32_0 : i32, i32
  }
  func.func @transform_5(%arg0: i32) -> (i32, i32) {
    %c0_i32 = arith.constant 0 : i32
    %c0_i32_0 = arith.constant 0 : i32
    %c0_i32_1 = arith.constant 0 : i32
    return %c0_i32, %c0_i32_0 : i32, i32
  }
  func.func @transform_6(%arg0: i32) -> (i32, i32) {
    %c0_i32 = arith.constant 0 : i32
    %c0_i32_0 = arith.constant 0 : i32
    %c0_i32_1 = arith.constant 0 : i32
    return %c0_i32, %c0_i32_0 : i32, i32
  }
  func.func @transform_7(%arg0: i32) -> (i32, i32) {
    %c0_i32 = arith.constant 0 : i32
    %c0_i32_0 = arith.constant 0 : i32
    return %arg0, %c0_i32 : i32, i32
  }
}

</mosaic_0001>

<bundles_post_ra>
// kernel: tpu_custom_call.1
= control target key start
LH: loop header
LB: loop body
LE: loop exit
PB: predicated region body
PF: predicated region fallthrough
CT: control target
= control target key end

     0   :  { %12 = vsyncpa [#allocation3], 0  ;;  %s1747_s24 = smov [#allocation2]   ;;  %s1936_s0 = inlined_call_operand.vmem [shape: f32[8,16], index: 0, kind: input, shape index: {}]   ;;  %s1937_s1 = inlined_call_operand.vmem [shape: bf16[16,512], index: 1, kind: input, shape index: {}]   ;;  %s1938_s2 = inlined_call_operand.vmem [shape: f32[1,512], index: 2, kind: input, shape index: {}]   ;;  %s1939_s3 = inlined_call_operand.hbm [shape: bf16[512,384], index: 3, kind: input, shape index: {}]   ;;  %s1940_s4 = inlined_call_operand.vmem [shape: f32[1,384], index: 4, kind: input, shape index: {}]   ;;  %s1941_s5 = inlined_call_operand.vmem [shape: bf16[384,4], index: 5, kind: input, shape index: {}]   ;;  %s1942_s6 = inlined_call_operand.vmem [shape: f32[1,4], index: 6, kind: input, shape index: {}]   ;;  %s1943_s7 = inlined_call_operand.vmem [shape: f32[8,3], index: 7, kind: output, shape index: {}]  }
   0x1   :  { %s24_s25 = sshll.u32 %s1747_s24, 4  ;;  %s1723_s28 = scalar_lea.hbm %s1939_s3, 12288  ;;  %s25_s25 = int_to_ptr.vmem [resolvable:$true] %s24_s25 }
   0x2   :  { %p1724_p0 = scmp.ne.s32.totalorder %s1939_s3, %s1723_s28  ;;  %p1727_p1 = scmp.lt.u32.totalorder %s1723_s28, %s1939_s3 }
   0x4   :  { %p1729_p2 = pnand %p1727_p1, %p1724_p0 }
   0x6   :  { %1732 = shalt.err (!%p1729_p2)
}
   0x7   :  { %s1733_s10 = scalar_lea.vmem %s25_s25, 12288  ;;  %p1738_p4 = scmp.lt.s32.totalorder %s25_s25, %s25_s25 }
   0x8   :  { %p1734_p3 = scmp.ne.s32.totalorder %s25_s25, %s1733_s10  ;;  %p1739_p5 = scmp.lt.s32.totalorder %s1733_s10, %s1733_s10 }
   0xa   :  { %p1740_p6 = por %p1739_p5, %p1738_p4 }
   0xc   :  { %p1741_p7 = pnand %p1740_p6, %p1734_p3 }
   0xe   :  { %1744 = shalt.err (!%p1741_p7)
}
   0xf   :  { %s1748_s11 = smov 192   ;;  %s1749_s12 = smov 12  }
  0x10   :  { %30 = dma.hbm_to_vmem [thread:$0]  %s1939_s3, 12288, %s25_s25, [#allocation3], %s1748_s11, %s1748_s11, %s1749_s12  }
  0x11   :  { %1745 = dma.done.wait [#allocation3], 12288  }
  0x12   :  { %1746 = vsyncadd [#allocation3], 4294955008  ;;  %v1750_v0 = vmov 0   ;;  %v1557_v1 = vld [vmem:[%s1937_s1 + $0x4] ss:$16 sps:$4 sm:$0xff]   ;;  %vm89_vm0 = vcmask 130048   ;;  %v49_v57 = vlaneseq }
  0x13   :  { %125 = vmatprep.mubr.bf16.mxu0 %v1750_v0  ;;  %166 = vmatprep.mubr.bf16.mxu1 %v1750_v0  ;;  %v1559_v2 = vld [vmem:[%s1937_s1] ss:$16 sps:$4 sm:$0xff]   ;;  %v1560_v5 = vld [vmem:[%s1937_s1 + $0xc] ss:$16 sps:$4 sm:$0xff]   ;;  %v1562_v6 = vld [vmem:[%s1937_s1 + $0x8] ss:$16 sps:$4 sm:$0xff]  }
  0x14   :  { %v41_v3 = vld [vmem:[%s1936_s0] sm:$0xff]  ;;  %93 = vmatprep.subr.bf16.mxu0 %v1557_v1  ;;  %134 = vmatprep.subr.bf16.mxu1 %v1560_v5  ;;  %v1568_v9 = vld [vmem:[#allocation2 + $0x1c] ss:$12 sps:$4 sm:$0xff]   ;;  %v1574_v13 = vld [vmem:[#allocation2 + $0x4c] ss:$12 sps:$4 sm:$0xff]   ;;  %v1822_v58 = vshrl.u32 %v49_v57, 7 }
  0x15   :  { %v42_v4 = vpack.c.bf16 %v41_v3, %v41_v3  ;;  %94 = vmatpush1.bf16.msra.mxu0 %v1559_v2  ;;  %v1563_v7 = vld [vmem:[#allocation2] ss:$12 sps:$4 sm:$0xff]   ;;  %v1565_v8 = vld [vmem:[#allocation2 + $0x4] ss:$12 sps:$4 sm:$0xff]   ;;  %135 = vmatpush1.bf16.msra.mxu1 %v1562_v6  ;;  %v1572_v14 = vld [vmem:[#allocation2 + $0x48] ss:$12 sps:$4 sm:$0xff]  }
  0x16   :  { %840 = vmatprep.subr.bf16.mxu0 %v1565_v8  ;;  %v1566_v10 = vld [vmem:[#allocation2 + $0x18] ss:$12 sps:$4 sm:$0xff]   ;;  %v1571_v11 = vld [vmem:[#allocation2 + $0x34] ss:$12 sps:$4 sm:$0xff]   ;;  %v1569_v12 = vld [vmem:[#allocation2 + $0x30] ss:$12 sps:$4 sm:$0xff]  }
  0x17   :  { %v1577_v15 = vld [vmem:[#allocation2 + $0x64] ss:$12 sps:$4 sm:$0xff]   ;;  %v1590_v16 = vld [vmem:[#allocation2 + $0xc8] ss:$12 sps:$4 sm:$0xff]   ;;  %v1575_v18 = vld [vmem:[#allocation2 + $0x60] ss:$12 sps:$4 sm:$0xff]  }
  0x18   :  { %1324 = vmatmul.mubr.msk.bf16.vlgmr.msra.gmra.mrb[0].mxu0 %vm89_vm0, %v42_v4  ;;  %1325 = vmatmul.mubr.msk.bf16.vlgmr.msra.gmra.mrb[0].mxu1 %vm89_vm0, %v42_v4  ;;  %v1591_v17 = vld [vmem:[#allocation2 + $0x8] ss:$12 sps:$4 sm:$0xff]   ;;  %v1595_v20 = vld [vmem:[#allocation2 + $0xe0] ss:$12 sps:$4 sm:$0xff]   ;;  %v1578_v22 = vld [vmem:[#allocation2 + $0x78] ss:$12 sps:$4 sm:$0xff]  }
  0x19   :  { %841 = vmatpush1.bf16.msra.mxu0 %v1563_v7  ;;  %1448 = vmatprep.subr.bf16.mxu1 %v1590_v16  ;;  %v1580_v19 = vld [vmem:[#allocation2 + $0x7c] ss:$12 sps:$4 sm:$0xff]   ;;  %v1596_v21 = vld [vmem:[#allocation2 + $0x20] ss:$12 sps:$4 sm:$0xff]   ;;  %v1600_v23 = vld [vmem:[#allocation2 + $0xf8] ss:$12 sps:$4 sm:$0xff]  }
  0x1a   :  { %842 = vmatprep.subr.bf16.mxu0 %v1568_v9  ;;  %1449 = vmatpush3.bf16.msra.mxu1 %v1591_v17  ;;  %v1601_v24 = vld [vmem:[#allocation2 + $0x38] ss:$12 sps:$4 sm:$0xff]   ;;  %v1583_v25 = vld [vmem:[#allocation2 + $0x94] ss:$12 sps:$4 sm:$0xff]   ;;  %v1605_v26 = vld [vmem:[#allocation2 + $0x110] ss:$12 sps:$4 sm:$0xff]  }
  0x1b   :  { %1450 = vmatprep.subr.bf16.mxu1 %v1595_v20  ;;  %v1606_v27 = vld [vmem:[#allocation2 + $0x50] ss:$12 sps:$4 sm:$0xff]   ;;  %v1586_v29 = vld [vmem:[#allocation2 + $0xac] ss:$12 sps:$4 sm:$0xff]   ;;  %v1610_v30 = vld [vmem:[#allocation2 + $0x128] ss:$12 sps:$4 sm:$0xff]  }
  0x1c   :  { %v1581_v28 = vld [vmem:[#allocation2 + $0x90] ss:$12 sps:$4 sm:$0xff]   ;;  %v1611_v31 = vld [vmem:[#allocation2 + $0x68] ss:$12 sps:$4 sm:$0xff]   ;;  %v1615_v34 = vld [vmem:[#allocation2 + $0x140] ss:$12 sps:$4 sm:$0xff]  }
  0x1d   :  { %843 = vmatpush1.bf16.msra.mxu0 %v1566_v10  ;;  %v1584_v32 = vld [vmem:[#allocation2 + $0xa8] ss:$12 sps:$4 sm:$0xff]   ;;  %v1589_v33 = vld [vmem:[#allocation2 + $0xc4] ss:$12 sps:$4 sm:$0xff]   ;;  %v1587_v35 = vld [vmem:[#allocation2 + $0xc0] ss:$12 sps:$4 sm:$0xff]  }
  0x1e   :  { %844 = vmatprep.subr.bf16.mxu0 %v1571_v11  ;;  %1451 = vmatpush3.bf16.msra.mxu1 %v1596_v21  ;;  %v1616_v36 = vld [vmem:[#allocation2 + $0x80] ss:$12 sps:$4 sm:$0xff]   ;;  %v1594_v37 = vld [vmem:[#allocation2 + $0xdc] ss:$12 sps:$4 sm:$0xff]   ;;  %v1592_v38 = vld [vmem:[#allocation2 + $0xd8] ss:$12 sps:$4 sm:$0xff]  }
  0x1f   :  { %1452 = vmatprep.subr.bf16.mxu1 %v1600_v23  ;;  %v1599_v39 = vld [vmem:[#allocation2 + $0xf4] ss:$12 sps:$4 sm:$0xff]   ;;  %v1597_v40 = vld [vmem:[#allocation2 + $0xf0] ss:$12 sps:$4 sm:$0xff]   ;;  %v1604_v41 = vld [vmem:[#allocation2 + $0x10c] ss:$12 sps:$4 sm:$0xff]  }
  0x20   :  { %v1602_v42 = vld [vmem:[#allocation2 + $0x108] ss:$12 sps:$4 sm:$0xff]   ;;  %v1609_v43 = vld [vmem:[#allocation2 + $0x124] ss:$12 sps:$4 sm:$0xff]   ;;  %v1607_v44 = vld [vmem:[#allocation2 + $0x120] ss:$12 sps:$4 sm:$0xff]  }
  0x21   :  { %845 = vmatpush1.bf16.msra.mxu0 %v1569_v12  ;;  %v1614_v45 = vld [vmem:[#allocation2 + $0x13c] ss:$12 sps:$4 sm:$0xff]   ;;  %v1612_v46 = vld [vmem:[#allocation2 + $0x138] ss:$12 sps:$4 sm:$0xff]   ;;  %v1619_v47 = vld [vmem:[#allocation2 + $0x154] ss:$12 sps:$4 sm:$0xff]  }
  0x22   :  { %846 = vmatprep.subr.bf16.mxu0 %v1574_v13  ;;  %1453 = vmatpush3.bf16.msra.mxu1 %v1601_v24  ;;  %v1620_v48 = vld [vmem:[#allocation2 + $0x158] ss:$12 sps:$4 sm:$0xff]   ;;  %v1617_v49 = vld [vmem:[#allocation2 + $0x150] ss:$12 sps:$4 sm:$0xff]   ;;  %v1622_v53 = vld [vmem:[#allocation2 + $0x168] ss:$12 sps:$4 sm:$0xff]  }
  0x23   :  { %1454 = vmatprep.subr.bf16.mxu1 %v1605_v26  ;;  %v1621_v50 = vld [vmem:[#allocation2 + $0x98] ss:$12 sps:$4 sm:$0xff]   ;;  %v1625_v52 = vld [vmem:[#allocation2 + $0x170] ss:$12 sps:$4 sm:$0xff]   ;;  %v1630_v56 = vld [vmem:[#allocation2 + $0x248] ss:$12 sps:$4 sm:$0xff]  }
  0x24   :  { %v1624_v51 = vld [vmem:[#allocation2 + $0x16c] ss:$12 sps:$4 sm:$0xff]   ;;  %v1626_v54 = vld [vmem:[#allocation2 + $0xb0] ss:$12 sps:$4 sm:$0xff]   ;;  %v51_v59 = vsub.s32 0, %v1822_v58  ;;  %v55_v61 = vsub.s32 1, %v1822_v58 }
  0x25   :  { %847 = vmatpush1.bf16.msra.mxu0 %v1572_v14  ;;  %v1629_v55 = vld [vmem:[#allocation2 + $0x184] ss:$12 sps:$4 sm:$0xff]   ;;  %v1828_v60 = vld [vmem:[%s1938_s2] sm:$0xf]  ;;  %v63_v62 = vsub.s32 3, %v1822_v58  ;;  %vm1752_vm1 = vmmov 0  }
  0x26   :  { %848 = vmatprep.subr.bf16.mxu0 %v1577_v15  ;;  %1455 = vmatpush3.bf16.msra.mxu1 %v1606_v27  ;;  %v52_v63 = vrot.slane %v1828_v60, %v51_v59  ;;  %v56_v0 = vrot.slane %v1828_v60, %v55_v61  ;;  %v1627_v16 = vld [vmem:[#allocation2 + $0x180] ss:$12 sps:$4 sm:$0xff]   ;;  %v1631_v17 = vld [vmem:[#allocation2 + $0x188] ss:$12 sps:$4 sm:$0xff]   ;;  %v1632_v23 = vld [vmem:[#allocation2 + $0x198] ss:$12 sps:$4 sm:$0xff]  }
  0x27   :  { %1456 = vmatprep.subr.bf16.mxu1 %v1610_v30  ;;  %v64_v2 = vrot.slane %v1828_v60, %v63_v62  ;;  %v1634_v20 = vld [vmem:[#allocation2 + $0x19c] ss:$12 sps:$4 sm:$0xff]   ;;  %v1635_v21 = vld [vmem:[#allocation2 + $0x260] ss:$12 sps:$4 sm:$0xff]   ;;  %v1640_v26 = vld [vmem:[#allocation2 + $0x278] ss:$12 sps:$4 sm:$0xff]  }
  0x28   :  { %v1636_v24 = vld [vmem:[#allocation2 + $0x1a0] ss:$12 sps:$4 sm:$0xff]   ;;  %v1637_v27 = vld [vmem:[#allocation2 + $0x1b0] ss:$12 sps:$4 sm:$0xff]   ;;  %vm1293_vm3 = vcmask 31744   ;;  %vm1313_vm4 = vcmask 23552  }
  0x29   :  { %849 = vmatpush1.bf16.msra.mxu0 %v1575_v18  ;;  %v1645_v30 = vld [vmem:[#allocation2 + $0x290] ss:$12 sps:$4 sm:$0xff]   ;;  %v1675_v62 = vld [vmem:[#allocation2 + $0x274] ss:$12 sps:$4 sm:$0xff]  }
  0x2a   :  { %850 = vmatprep.subr.bf16.mxu0 %v1580_v19  ;;  %1457 = vmatpush3.bf16.msra.mxu1 %v1611_v31  ;;  %v1642_v31 = vld [vmem:[#allocation2 + $0x1c8] ss:$12 sps:$4 sm:$0xff]  }
  0x2b   :  { %1458 = vmatprep.subr.bf16.mxu1 %v1615_v34  ;;  %v1650_v34 = vld [vmem:[#allocation2 + $0x2a8] ss:$12 sps:$4 sm:$0xff]  }
  0x2d   :  { %851 = vmatpush1.bf16.msra.mxu0 %v1578_v22 }
  0x2e   :  { %852 = vmatprep.subr.bf16.mxu0 %v1583_v25  ;;  %1459 = vmatpush3.bf16.msra.mxu1 %v1616_v36  ;;  %v1639_v25 = vld [vmem:[#allocation2 + $0x1b4] ss:$12 sps:$4 sm:$0xff]  }
  0x2f   :  { %1460 = vmatprep.subr.bf16.mxu1 %v1620_v48  ;;  %v1647_v36 = vld [vmem:[#allocation2 + $0x1e0] ss:$12 sps:$4 sm:$0xff]  }
  0x30   :  { %v1664_v48 = vld [vmem:[#allocation2 + $0x22c] ss:$12 sps:$4 sm:$0xff]  }
  0x31   :  { %853 = vmatpush1.bf16.msra.mxu0 %v1581_v28  ;;  %v1641_v28 = vld [vmem:[#allocation2 + $0x1b8] ss:$12 sps:$4 sm:$0xff]  }
  0x32   :  { %854 = vmatprep.subr.bf16.mxu0 %v1586_v29  ;;  %1461 = vmatpush3.bf16.msra.mxu1 %v1621_v50  ;;  %v1644_v29 = vld [vmem:[#allocation2 + $0x1cc] ss:$12 sps:$4 sm:$0xff]  }
  0x33   :  { %1462 = vmatprep.subr.bf16.mxu1 %v1625_v52  ;;  %v1666_v52 = vld [vmem:[#allocation2 + $0x230] ss:$12 sps:$4 sm:$0xff]  }
  0x35   :  { %855 = vmatpush1.bf16.msra.mxu0 %v1584_v32  ;;  %v1646_v32 = vld [vmem:[#allocation2 + $0x1d0] ss:$12 sps:$4 sm:$0xff]  }
  0x36   :  { %856 = vmatprep.subr.bf16.mxu0 %v1589_v33  ;;  %1463 = vmatpush3.bf16.msra.mxu1 %v1626_v54  ;;  %v1649_v33 = vld [vmem:[#allocation2 + $0x1e4] ss:$12 sps:$4 sm:$0xff]  }
  0x37   :  { %1470 = vmatprep.subr.bf16.mxu1 %v1630_v56  ;;  %v1672_v56 = vld [vmem:[#allocation2 + $0x25c] ss:$12 sps:$4 sm:$0xff]  }
  0x39   :  { %857 = vmatpush1.bf16.msra.mxu0 %v1587_v35  ;;  %v59_v35 = vsub.s32 2, %v1822_v58  ;;  %v1708_v58 = vld [vmem:[%s1941_s5 + $0x88] sm:$0xff]  }
  0x3a   :  { %858 = vmatprep.subr.bf16.mxu0 %v1594_v37  ;;  %v1651_v37 = vld [vmem:[#allocation2 + $0x1e8] ss:$12 sps:$4 sm:$0xff]  }
  0x3d   :  { %859 = vmatpush1.bf16.msra.mxu0 %v1592_v38  ;;  %v1654_v38 = vld [vmem:[#allocation2 + $0x1fc] ss:$12 sps:$4 sm:$0xff]  }
  0x3e   :  { %860 = vmatprep.subr.bf16.mxu0 %v1599_v39  ;;  %v1655_v39 = vld [vmem:[#allocation2 + $0x2c0] ss:$12 sps:$4 sm:$0xff]  }
  0x41   :  { %861 = vmatpush1.bf16.msra.mxu0 %v1597_v40  ;;  %v60_v40 = vrot.slane %v1828_v60, %v59_v35  ;;  %v1670_v60 = vld [vmem:[#allocation2 + $0x258] ss:$12 sps:$4 sm:$0xff]  }
  0x42   :  { %862 = vmatprep.subr.bf16.mxu0 %v1604_v41  ;;  %v1652_v41 = vld [vmem:[#allocation2 + $0x1f8] ss:$12 sps:$4 sm:$0xff]  }
  0x45   :  { %863 = vmatpush1.bf16.msra.mxu0 %v1602_v42  ;;  %v1656_v42 = vld [vmem:[#allocation2 + $0x200] ss:$12 sps:$4 sm:$0xff]  }
  0x46   :  { %864 = vmatprep.subr.bf16.mxu0 %v1609_v43  ;;  %v1659_v43 = vld [vmem:[#allocation2 + $0x214] ss:$12 sps:$4 sm:$0xff]  }
  0x49   :  { %865 = vmatpush1.bf16.msra.mxu0 %v1607_v44  ;;  %v1660_v44 = vld [vmem:[#allocation2 + $0x2d8] ss:$12 sps:$4 sm:$0xff]  }
  0x4a   :  { %866 = vmatprep.subr.bf16.mxu0 %v1614_v45 }
  0x4d   :  { %867 = vmatpush1.bf16.msra.mxu0 %v1612_v46  ;;  %v1657_v46 = vld [vmem:[#allocation2 + $0x210] ss:$12 sps:$4 sm:$0xff]  }
  0x4e   :  { %868 = vmatprep.subr.bf16.mxu0 %v1619_v47  ;;  %v1661_v47 = vld [vmem:[#allocation2 + $0x218] ss:$12 sps:$4 sm:$0xff]  }
  0x51   :  { %869 = vmatpush1.bf16.msra.mxu0 %v1617_v49  ;;  %v1665_v49 = vld [vmem:[#allocation2 + $0x2f0] ss:$12 sps:$4 sm:$0xff]  }
  0x52   :  { %870 = vmatprep.subr.bf16.mxu0 %v1624_v51  ;;  %v1662_v51 = vld [vmem:[#allocation2 + $0x228] ss:$12 sps:$4 sm:$0xff]  }
  0x55   :  { %871 = vmatpush1.bf16.msra.mxu0 %v1622_v53  ;;  %v1669_v53 = vld [vmem:[#allocation2 + $0x244] ss:$12 sps:$4 sm:$0xff]  }
  0x56   :  { %881 = vmatprep.subr.bf16.mxu0 %v1629_v55  ;;  %v1667_v55 = vld [vmem:[#allocation2 + $0x240] ss:$12 sps:$4 sm:$0xff]  }
  0xeb   :  { %v127_v1 = vpop.f32.mrb[0].mxu0  ;;  %v1839_v7 = vpop.f32.mrb[0].mxu1 }
  0xec   :  { %v128_v3 = vadd.f32 %v127_v1, %v52_v63  ;;  %v129_v4 = vpop.f32.mrb[1].mxu0  ;;  %v170_v10 = vpop.f32.mrb[1].mxu1  ;;  %v169_v45 = vadd.f32 %v1839_v7, %v60_v40  ;;  %v1673_v63 = vld [vmem:[#allocation2 + $0x270] ss:$12 sps:$4 sm:$0xff]   ;;  %v1676_v1 = vld [vmem:[#allocation2 + $0x288] ss:$12 sps:$4 sm:$0xff]  }
  0xed   :  { %v130_v5 = vadd.f32 %v129_v4, %v56_v0  ;;  %v131_v6 = vpop.f32.mrb[2].mxu0  ;;  %v171_v12 = vadd.f32 %v170_v10, %v64_v2  ;;  %v172_v13 = vpop.f32.mrb[2].mxu1  ;;  %v1678_v0 = vld [vmem:[#allocation2 + $0x28c] ss:$12 sps:$4 sm:$0xff]   ;;  %v1681_v2 = vld [vmem:[#allocation2 + $0x2a4] ss:$12 sps:$4 sm:$0xff]  }
  0xee   :  { %v175_v8 = vmax.f32 %v128_v3, 0.0  ;;  %v132_v9 = vpop.f32.mrb[3].mxu0  ;;  %v173_v14 = vpop.f32.mrb[3].mxu1  ;;  %v177_v50 = vmax.f32 %v169_v45, 0.0  ;;  %v1679_v3 = vld [vmem:[#allocation2 + $0x2a0] ss:$12 sps:$4 sm:$0xff]  }
  0xef   :  { %v176_v11 = vmax.f32 %v130_v5, 0.0  ;;  %v178_v18 = vmax.f32 %v171_v12, 0.0  ;;  %v1684_v4 = vld [vmem:[#allocation2 + $0x2bc] ss:$12 sps:$4 sm:$0xff]   ;;  %v1682_v5 = vld [vmem:[#allocation2 + $0x2b8] ss:$12 sps:$4 sm:$0xff]  }
  0xf0   :  { %v179_v19 = vpack.c.bf16 %v175_v8, %v175_v8  ;;  %v181_v54 = vpack.c.bf16 %v177_v50, %v177_v50  ;;  %v1687_v6 = vld [vmem:[#allocation2 + $0x2d4] ss:$12 sps:$4 sm:$0xff]   ;;  %v1685_v7 = vld [vmem:[#allocation2 + $0x2d0] ss:$12 sps:$4 sm:$0xff]   ;;  %v1690_v8 = vld [vmem:[#allocation2 + $0x2ec] ss:$12 sps:$4 sm:$0xff]  }
  0xf1   :  { %v180_v15 = vpack.c.bf16 %v176_v11, %v176_v11  ;;  %v182_v22 = vpack.c.bf16 %v178_v18, %v178_v18  ;;  %v1688_v9 = vld [vmem:[#allocation2 + $0x2e8] ss:$12 sps:$4 sm:$0xff]   ;;  %v1691_v10 = vld [vmem:[%s1941_s5 + $0x40] sm:$0xff]  }
  0xf2   :  { %v1692_v11 = vld [vmem:[%s1941_s5] sm:$0xff]   ;;  %v1693_v12 = vld [vmem:[%s1941_s5 + $0x48] sm:$0xff]   ;;  %v1695_v14 = vld [vmem:[%s1941_s5 + $0x50] sm:$0xff]  }
  0xf3   :  { %872 = vmatprep.mubr.bf16.mxu0 %v180_v15  ;;  %954 = vmatprep.mubr.bf16.mxu1 %v180_v15  ;;  %v1694_v13 = vld [vmem:[%s1941_s5 + $0x8] sm:$0xff]   ;;  %v1696_v15 = vld [vmem:[%s1941_s5 + $0x10] sm:$0xff]   ;;  %v1699_v18 = vld [vmem:[%s1941_s5 + $0x60] sm:$0xff]  }
  0xf4   :  { %873 = vmatmul.mubr.bf16.vlgmr.msra.gmra.mrb[4].mxu0 %v179_v19  ;;  %955 = vmatmul.mubr.bf16.vlgmr.msra.gmra.mrb[4].mxu1 %v179_v19  ;;  %v1700_v19 = vld [vmem:[%s1941_s5 + $0x20] sm:$0xff]  }
  0xf5   :  { %882 = vmatpush1.bf16.msra.mxu0 %v1627_v16  ;;  %1471 = vmatpush3.bf16.msra.mxu1 %v1631_v17  ;;  %v1697_v16 = vld [vmem:[%s1941_s5 + $0x58] sm:$0xff]  }
  0xf6   :  { %883 = vmatprep.subr.bf16.mxu0 %v1634_v20  ;;  %1472 = vmatprep.subr.bf16.mxu1 %v1635_v21  ;;  %v1698_v17 = vld [vmem:[%s1941_s5 + $0x18] sm:$0xff]   ;;  %v1701_v20 = vld [vmem:[%s1941_s5 + $0x68] sm:$0xff]  }
  0xf7   :  { %994 = vmatprep.mubr.bf16.mxu1 %v182_v22  ;;  %913 = vmatprep.mubr.bf16.mxu0 %v182_v22  ;;  %v1702_v21 = vld [vmem:[%s1941_s5 + $0x28] sm:$0xff]   ;;  %v1703_v22 = vld [vmem:[%s1941_s5 + $0x70] sm:$0xff]  }
  0xf9   :  { %884 = vmatpush1.bf16.msra.mxu0 %v1632_v23  ;;  %1473 = vmatpush3.bf16.msra.mxu1 %v1636_v24  ;;  %v1704_v23 = vld [vmem:[%s1941_s5 + $0x30] sm:$0xff]   ;;  %v1705_v24 = vld [vmem:[%s1941_s5 + $0x78] sm:$0xff]  }
  0xfa   :  { %885 = vmatprep.subr.bf16.mxu0 %v1639_v25  ;;  %1474 = vmatprep.subr.bf16.mxu1 %v1640_v26  ;;  %v1706_v25 = vld [vmem:[%s1941_s5 + $0x38] sm:$0xff]   ;;  %v1751_v26 = vmov 0.0  }
  0xfd   :  { %886 = vmatpush1.bf16.msra.mxu0 %v1637_v27  ;;  %1475 = vmatpush3.bf16.msra.mxu1 %v1641_v28 }
  0xfe   :  { %887 = vmatprep.subr.bf16.mxu0 %v1644_v29  ;;  %1476 = vmatprep.subr.bf16.mxu1 %v1645_v30 }
 0x101   :  { %888 = vmatpush1.bf16.msra.mxu0 %v1642_v31  ;;  %1477 = vmatpush3.bf16.msra.mxu1 %v1646_v32  ;;  %v311_v32 = vld [vmem:[%s1940_s4] sm:$0x7] }
 0x102   :  { %889 = vmatprep.subr.bf16.mxu0 %v1649_v33  ;;  %1478 = vmatprep.subr.bf16.mxu1 %v1650_v34  ;;  %v324_v33 = vrot.slane %v311_v32, %v59_v35 }
 0x105   :  { %890 = vmatpush1.bf16.msra.mxu0 %v1647_v36  ;;  %1479 = vmatpush3.bf16.msra.mxu1 %v1651_v37 }
 0x106   :  { %891 = vmatprep.subr.bf16.mxu0 %v1654_v38  ;;  %1480 = vmatprep.subr.bf16.mxu1 %v1655_v39 }
 0x109   :  { %892 = vmatpush1.bf16.msra.mxu0 %v1652_v41  ;;  %1481 = vmatpush3.bf16.msra.mxu1 %v1656_v42  ;;  %v316_v42 = vrot.slane %v311_v32, %v51_v59  ;;  %v1709_v59 = vld [vmem:[%s1941_s5 + $0x90] sm:$0xff]  }
 0x10a   :  { %893 = vmatprep.subr.bf16.mxu0 %v1659_v43  ;;  %1482 = vmatprep.subr.bf16.mxu1 %v1660_v44  ;;  %v320_v43 = vrot.slane %v311_v32, %v55_v61  ;;  %v1710_v61 = vld [vmem:[%s1941_s5 + $0x98] sm:$0xff]  }
 0x10d   :  { %894 = vmatpush1.bf16.msra.mxu0 %v1657_v46  ;;  %1483 = vmatpush3.bf16.msra.mxu1 %v1661_v47 }
 0x10e   :  { %895 = vmatprep.subr.bf16.mxu0 %v1664_v48  ;;  %1484 = vmatprep.subr.bf16.mxu1 %v1665_v49 }
 0x111   :  { %896 = vmatpush1.bf16.msra.mxu0 %v1662_v51  ;;  %1485 = vmatpush3.bf16.msra.mxu1 %v1666_v52  ;;  %v1707_v52 = vld [vmem:[%s1941_s5 + $0x80] sm:$0xff]  }
 0x112   :  { %897 = vmatprep.subr.bf16.mxu0 %v1669_v53  ;;  %1492 = vmatprep.subr.bf16.mxu1 %v1691_v10 }
 0x114   :  { %995 = vmatmul.mubr.bf16.vlgmr.msra.gmra.mrb[8].mxu1 %v181_v54 }
 0x115   :  { %898 = vmatpush1.bf16.msra.mxu0 %v1667_v55  ;;  %1493 = vmatpush3.bf16.msra.mxu1 %v1692_v11  ;;  %v1712_v55 = vld [vmem:[%s1941_s5 + $0xa8] sm:$0xff]  }
 0x116   :  { %899 = vmatprep.subr.bf16.mxu0 %v1672_v56  ;;  %1494 = vmatprep.subr.bf16.mxu1 %v1693_v12  ;;  %v1713_v56 = vld [vmem:[%s1941_s5 + $0xb0] sm:$0xff]   ;;  %v1289_v12 = vand.u32 127, %v49_v57 }
 0x118   :  { %vm1290_vm2 = vcmp.lt.s32.totalorder %v1289_v12, 2 }
 0x119   :  { %900 = vmatpush1.bf16.msra.mxu0 %v1670_v60  ;;  %1495 = vmatpush3.bf16.msra.mxu1 %v1694_v13  ;;  %v1714_v60 = vld [vmem:[%s1941_s5 + $0xb8] sm:$0xff]  }
 0x11a   :  { %901 = vmatprep.subr.bf16.mxu0 %v1675_v62  ;;  %1496 = vmatprep.subr.bf16.mxu1 %v1695_v14 }
 0x11d   :  { %902 = vmatpush1.bf16.msra.mxu0 %v1673_v63  ;;  %1497 = vmatpush3.bf16.msra.mxu1 %v1696_v15 }
 0x11e   :  { %903 = vmatprep.subr.bf16.mxu0 %v1678_v0  ;;  %1498 = vmatprep.subr.bf16.mxu1 %v1697_v16 }
 0x121   :  { %904 = vmatpush1.bf16.msra.mxu0 %v1676_v1  ;;  %1499 = vmatpush3.bf16.msra.mxu1 %v1698_v17  ;;  %v1753_v17 = vmov 3  }
 0x122   :  { %905 = vmatprep.subr.bf16.mxu0 %v1681_v2  ;;  %1500 = vmatprep.subr.bf16.mxu1 %v1699_v18 }
 0x123   :  { %1556 = vset.pattern.permute.xlu0 %v1753_v17 }
 0x125   :  { %906 = vmatpush1.bf16.msra.mxu0 %v1679_v3  ;;  %1501 = vmatpush3.bf16.msra.mxu1 %v1700_v19 }
 0x126   :  { %907 = vmatprep.subr.bf16.mxu0 %v1684_v4  ;;  %1502 = vmatprep.subr.bf16.mxu1 %v1701_v20 }
 0x129   :  { %908 = vmatpush1.bf16.msra.mxu0 %v1682_v5  ;;  %1503 = vmatpush3.bf16.msra.mxu1 %v1702_v21  ;;  %v1422_v5 = vld [vmem:[%s1942_s6] ss:$0 sm:$0xff] }
 0x12a   :  { %909 = vmatprep.subr.bf16.mxu0 %v1687_v6  ;;  %1504 = vmatprep.subr.bf16.mxu1 %v1703_v22 }
 0x12d   :  { %910 = vmatpush1.bf16.msra.mxu0 %v1685_v7  ;;  %1505 = vmatpush3.bf16.msra.mxu1 %v1704_v23 }
 0x12e   :  { %911 = vmatprep.subr.bf16.mxu0 %v1690_v8  ;;  %1506 = vmatprep.subr.bf16.mxu1 %v1705_v24 }
 0x131   :  { %912 = vmatpush1.bf16.msra.mxu0 %v1688_v9  ;;  %1507 = vmatpush3.bf16.msra.mxu1 %v1706_v25 }
 0x132   :  { %1523 = vmatprep.subr.bf16.mxu1 %v1751_v26 }
 0x134   :  { %914 = vmatmul.mubr.bf16.vlgmr.msra.gmra.mrb[4].mxu0 %v181_v54  ;;  %v1711_v54 = vld [vmem:[%s1941_s5 + $0xa0] sm:$0xff]  }
 0x1c7   :  { %v1464_v27 = vpop.f32.mrb[4].mxu1 }
 0x1c8   :  { %v1465_v28 = vpop.f32.mrb[5].mxu1 }
 0x1c9   :  { %v1466_v29 = vadd.f32 %v1465_v28, %v1464_v27  ;;  %v1467_v30 = vpop.f32.mrb[6].mxu1 }
 0x1ca   :  { %v1468_v31 = vpop.f32.mrb[7].mxu1 }
 0x1cb   :  { %v957_v37 = vadd.f32 %v1466_v29, %v324_v33 }
 0x1e7   :  { %v1486_v34 = vpop.f32.mrb[8].mxu1 }
 0x1e8   :  { %v1487_v36 = vpop.f32.mrb[9].mxu1 }
 0x1e9   :  { %v1488_v38 = vadd.f32 %v1487_v36, %v1486_v34  ;;  %v1489_v39 = vpop.f32.mrb[10].mxu1 }
 0x1ea   :  { %v1490_v40 = vpop.f32.mrb[11].mxu1 }
 0x1eb   :  { %v997_v41 = vadd.f32 %v1488_v38, %v957_v37 }
 0x1ed   :  { %v1004_v62 = vmax.f32 %v997_v41, 0.0 }
 0x1ef   :  { %v1007_v63 = vpack.c.bf16 %v1004_v62, %v1004_v62 }
 0x207   :  { %v915_v44 = vpop.f32.mrb[4].mxu0 }
 0x208   :  { %v1543_v45 = vadd.f32 %v915_v44, %v316_v42  ;;  %v917_v46 = vpop.f32.mrb[5].mxu0 }
 0x209   :  { %v1544_v47 = vadd.f32 %v917_v46, %v320_v43  ;;  %v919_v48 = vpop.f32.mrb[6].mxu0 }
 0x20a   :  { %v1002_v49 = vmax.f32 %v1543_v45, 0.0  ;;  %v920_v35 = vpop.f32.mrb[7].mxu0 }
 0x20b   :  { %v1003_v50 = vmax.f32 %v1544_v47, 0.0 }
 0x20c   :  { %v1005_v53 = vpack.c.bf16 %v1002_v49, %v1002_v49 }
 0x20d   :  { %v1006_v51 = vpack.c.bf16 %v1003_v50, %v1003_v50 }
 0x20f   :  { %1239 = vmatprep.mubr.bf16.mxu1 %v1006_v51 }
 0x210   :  { %1240 = vmatmul.mubr.bf16.vlgmr.msra.gmra.mrb[12].mxu1 %v1005_v53 }
 0x211   :  { %1524 = vmatpush3.bf16.msra.mxu1 %v1707_v52  ;;  %1539 = vmatprep.mubr.msk.bf16.mxu1 %vm1752_vm1, %v1751_v26 }
 0x212   :  { %1525 = vmatprep.subr.bf16.mxu1 %v1751_v26 }
 0x215   :  { %1526 = vmatpush3.bf16.msra.mxu1 %v1708_v58 }
 0x216   :  { %1527 = vmatprep.subr.bf16.mxu1 %v1751_v26 }
 0x219   :  { %1528 = vmatpush3.bf16.msra.mxu1 %v1709_v59 }
 0x21a   :  { %1529 = vmatprep.subr.bf16.mxu1 %v1751_v26 }
 0x21d   :  { %1530 = vmatpush3.bf16.msra.mxu1 %v1710_v61 }
 0x21e   :  { %1531 = vmatprep.subr.bf16.mxu1 %v1751_v26 }
 0x221   :  { %1532 = vmatpush3.bf16.msra.mxu1 %v1711_v54 }
 0x222   :  { %1533 = vmatprep.subr.bf16.mxu1 %v1751_v26 }
 0x225   :  { %1534 = vmatpush3.bf16.msra.mxu1 %v1712_v55 }
 0x226   :  { %1535 = vmatprep.subr.bf16.mxu1 %v1751_v26 }
 0x229   :  { %1536 = vmatpush3.bf16.msra.mxu1 %v1713_v56 }
 0x22a   :  { %1537 = vmatprep.subr.bf16.mxu1 %v1751_v26 }
 0x22d   :  { %1538 = vmatpush3.bf16.msra.mxu1 %v1714_v60 }
 0x230   :  { %1540 = vmatmul.mubr.bf16.vlgmr.msra.gmra.mrb[16].mxu1 %v1007_v63 }
 0x2e3   :  { %v1508_v0 = vpop.f32.mrb[12].mxu1 }
 0x2e4   :  { %v1509_v1 = vpop.f32.mrb[13].mxu1 }
 0x2e5   :  { %v1510_v2 = vadd.f32 %v1509_v1, %v1508_v0  ;;  %v1511_v3 = vpop.f32.mrb[14].mxu1 }
 0x2e6   :  { %v1512_v4 = vpop.f32.mrb[15].mxu1 }
 0x2e7   :  { %v1242_v6 = vadd.f32 %v1510_v2, %v1422_v5 }
 0x303   :  { %v1281_v7 = vpop.f32.mrb[16].mxu1 }
 0x304   :  { %v1282_v8 = vadd.f32 %v1281_v7, %v1242_v6  ;;  %v1541_v9 = vpop.f32.mrb[17].mxu1 }
 0x305   :  { %v1284_v10 = vpop.f32.mrb[18].mxu1 }
 0x306   :  { %1715 = vtanh.f32 %v1282_v8  ;;  %v1542_v11 = vpop.f32.mrb[19].mxu1  ;;  %v1447_v18 = vmul.f32 -1.442695, %v1282_v8 }
 0x308   :  { %1717 = vpow2.f32 %v1447_v18 }
 0x310   :  { %v1716_v13 = vpop.eup %1715 }
 0x311   :  { %v1291_v14 = vsel %vm1290_vm2, %v1716_v13, 0.0 }
 0x312   :  { %v1292_v15 = vmul.f32 %v1291_v14, %v1291_v14  ;;  %v1718_v19 = vpop.eup %1717 }
 0x313   :  { %v1302_v20 = vadd.f32 1.0, %v1718_v19 }
 0x314   :  { %v1294_v16 = vsel %vm1293_vm3, %v1292_v15, 0.0 }
 0x315   :  { %1295 = vadd.xlane.f32.xlu0 %v1294_v16  ;;  %1719 = vrcp.f32 %v1302_v20 }
 0x31f   :  { %v1720_v23 = vpop.eup %1719 }
 0x3a2   :  { %v1296_v21 = vpop.xlane.xlu0 %1295 }
 0x3a3   :  { %v1297_v22 = vmax.f32 %v1296_v21, 1e-24 }
 0x3a5   :  { %1721 = vrsqrt.f32 %v1297_v22 }
 0x3af   :  { %v1722_v57 = vpop.eup %1721 }
 0x3b0   :  { %v1305_v24 = vmul.f32 %v1722_v57, %v1720_v23 }
 0x3b2   :  { %1308 = vperm.xlu0 %1556, %v1305_v24  }
 0x431   :  { %v1309_v25 = vpop.permute.xlu0 %1308 }
 0x432   :  { %v1311_v26 = vmul.f32 %v1716_v13, %v1309_v25 }
 0x434   :  { %v1312_v27 = vsel %vm1290_vm2, %v1311_v26, %v1716_v13 }
 0x435   :  { %1314 = vst.msk [vmem:[%s1943_s7] sm:$0xff] %vm1313_vm4, %v1312_v27 }
 0x436   :  { %1319 = vsyncpa [#allocation3], 1 }

</bundles_post_ra>
